<compile_context>
chip_gen: v7x
topology: tpu7x:2x2x1
jax: 0.10.0
libtpu: 0.0.40
codegen_flags: <defaults>
</compile_context>

<pallas_src>
import jax
import jax.numpy as jnp
from jax.experimental import pallas as pl
from jax.experimental.pallas import tpu as pltpu


def _round_up(a, b):
    return ((a + b - 1) // b) * b


_TILE_CANDS = (1024, 512, 256, 128)
_VMEM_BUDGET = 24 * 1024 * 1024          # tile-selection budget (bytes)
_VMEM_LIMIT = 32 * 1024 * 1024           # compiler scoped-VMEM limit (bytes)


def _vmem_bytes(tn, tk, d_in_p, d_out_p, adj_bytes):
    """Conservative working-set estimate (double-buffered inputs/output)."""
    buf = (tn * d_in_p * 4          # x row tile (f32)
           + tk * d_in_p * 4        # x K-slab (f32)
           + tn * tk * adj_bytes    # adjacency tile
           + 2 * d_in_p * d_out_p * 4   # concatenated weights
           + tn * d_out_p * 4)      # output tile
    scratch = tn * 2 * d_in_p * 4   # [x_row | agg] accumulator
    return 2 * buf + scratch


def _hbm_cost(n, tn, tk, d_in_p, d_out_p, adj_bytes):
    """Approximate HBM bytes moved (+ per-grid-step overhead in byte-equiv)."""
    n_pad = _round_up(n, max(tn, tk))
    n_row = n_pad // tn
    n_k = n_pad // tk
    adj = n_pad * n_pad * adj_bytes                 # adjacency, read once
    x_stream = n_row * n_pad * d_in_p * 4           # full x per row tile
    x_row = n_pad * d_in_p * 4                      # self-term row tiles
    out = n_pad * d_out_p * 4
    w = 2 * d_in_p * d_out_p * 4
    step_overhead = n_row * n_k * 350_000           # ~0.35 us/step @ ~1 TB/s
    return adj + x_stream + x_row + out + w + step_overhead


def _choose_tiles(n, d_in_p, d_out_p, adj_bytes):
    """Pick (N_pad, TN, TK): (8,128)-aligned, VMEM-feasible, min HBM cost."""
    cap = _round_up(max(n, 1), 128)
    best = None
    for tn in _TILE_CANDS:
        if tn > max(cap, 128):
            continue
        for tk in _TILE_CANDS:
            if tk > max(cap, 128):
                continue
            if _vmem_bytes(tn, tk, d_in_p, d_out_p, adj_bytes) > _VMEM_BUDGET:
                continue
            cost = _hbm_cost(n, tn, tk, d_in_p, d_out_p, adj_bytes)
            if best is None or cost < best[0]:
                best = (cost, tn, tk)
    if best is None:
        tn, tk = 128, 128        # huge D_in fallback
    else:
        _, tn, tk = best
    n_pad = _round_up(n, max(tn, tk))
    return n_pad, tn, tk


def gnn_layer_kernel(x_row_ref, x_k_ref, adj_ref, w_ref, o_ref, xa_ref):
    # x_row_ref : (TN, D_in_p)        row tile of node features (self term)
    # x_k_ref   : (TK, D_in_p)        K-slab of the FULL node-feature matrix
    # adj_ref   : (TN, TK)            adjacency tile (bf16 0/1, or f32)
    # w_ref     : (2*D_in_p, D_out_p) [W_self.T ; W_neigh.T] (pre-transposed)
    # o_ref     : (TN, D_out_p)
    # xa_ref    : (TN, 2*D_in_p)      f32 scratch: [x_row | sum_k adj_ik @ x_k]
    k = pl.program_id(1)
    d_in_p = x_row_ref.shape[1]

    # Neighborhood aggregation for this K slab: adj_tile @ x_k        (MXU)
    agg_k = jnp.dot(
        adj_ref[...].astype(jnp.float32),
        x_k_ref[...],
        preferred_element_type=jnp.float32,
    )

    @pl.when(k == 0)
    def _init():
        xa_ref[:, :d_in_p] = x_row_ref[...].astype(jnp.float32)
        xa_ref[:, d_in_p:] = agg_k

    @pl.when(k > 0)
    def _accumulate():
        xa_ref[:, d_in_p:] += agg_k

    # Finalize: one fused projection  [x_row | agg] @ [WsT ; WnT]     (MXU)
    @pl.when(k == pl.num_programs(1) - 1)
    def _finalize():
        o_ref[...] = jnp.dot(
            xa_ref[...], w_ref[...],
            preferred_element_type=jnp.float32,
        ).astype(o_ref.dtype)


def gnn_layer(node_feats, adj_matrix, w_self, w_neigh, *, cast_adj_bf16=True):
    """Pallas implementation of GNNLayer.forward.

    node_feats: [N, D_in] f32, adj_matrix: [N, N],
    w_self / w_neigh: [D_out, D_in] (nn.Linear convention) -> out [N, D_out].
    """
    N, D_in = node_feats.shape
    D_out = w_self.shape[0]
    assert adj_matrix.shape == (N, N)
    assert w_self.shape == (D_out, D_in)
    assert w_neigh.shape == (D_out, D_in)

    out_dtype = node_feats.dtype
    D_in_p = _round_up(D_in, 128)
    D_out_p = _round_up(D_out, 128)

    # Adjacency: bf16 halves the dominant N^2 HBM stream; exactly lossless
    # for 0/1 adjacency.  Pass cast_adj_bf16=False for weighted adjacencies.
    adj_dt = jnp.bfloat16 if cast_adj_bf16 else jnp.float32
    adj_bytes = jnp.dtype(adj_dt).itemsize

    N_pad, TN, TK = _choose_tiles(N, D_in_p, D_out_p, adj_bytes)

    # Zero-padded f32 node features.
    x_p = jnp.zeros((N_pad, D_in_p), jnp.float32)
    x_p = x_p.at[:N, :D_in].set(node_feats.astype(jnp.float32))

    adj_p = jnp.zeros((N_pad, N_pad), adj_dt)
    adj_p = adj_p.at[:N, :N].set(adj_matrix.astype(adj_dt))

    # Pre-transposed, padded, concatenated weights [W_self.T ; W_neigh.T].
    w_cat = jnp.zeros((2 * D_in_p, D_out_p), jnp.float32)
    w_cat = w_cat.at[:D_in, :D_out].set(w_self.T.astype(jnp.float32))
    w_cat = w_cat.at[D_in_p:D_in_p + D_in, :D_out].set(
        w_neigh.T.astype(jnp.float32))

    grid = (N_pad // TN, N_pad // TK)

    flops = (2 * N_pad * N_pad * D_in_p            # adjacency aggregation
             + 2 * N_pad * (2 * D_in_p) * D_out_p)  # fused projection
    bytes_accessed = _hbm_cost(N_pad, TN, TK, D_in_p, D_out_p, adj_bytes)
    cost = pl.CostEstimate(flops=flops, transcendentals=0,
                           bytes_accessed=bytes_accessed)

    out_p = pl.pallas_call(
        gnn_layer_kernel,
        out_shape=jax.ShapeDtypeStruct((N_pad, D_out_p), out_dtype),
        grid_spec=pltpu.PrefetchScalarGridSpec(
            num_scalar_prefetch=0,
            grid=grid,
            in_specs=[
                pl.BlockSpec((TN, D_in_p), lambda i, k: (i, 0)),   # x row tile
                pl.BlockSpec((TK, D_in_p), lambda i, k: (k, 0)),   # x K-slab
                pl.BlockSpec((TN, TK), lambda i, k: (i, k)),       # adj tile
                pl.BlockSpec((2 * D_in_p, D_out_p),
                             lambda i, k: (0, 0)),                 # weights
            ],
            out_specs=pl.BlockSpec((TN, D_out_p), lambda i, k: (i, 0)),
            scratch_shapes=[pltpu.VMEM((TN, 2 * D_in_p), jnp.float32)],
        ),
        compiler_params=pltpu.CompilerParams(
            dimension_semantics=("parallel", "arbitrary"),
            vmem_limit_bytes=_VMEM_LIMIT,
        ),
        cost_estimate=cost,
    )(x_p, x_p, adj_p, w_cat)

    return out_p[:N, :D_out]


def gnn_layer_ref(node_feats, adj_matrix, w_self, w_neigh):
    """Pure-JAX reference (mirrors the PyTorch forward)."""
    h_self = node_feats @ w_self.T
    h_neigh = (adj_matrix @ node_feats) @ w_neigh.T
    return h_self + h_neigh


if __name__ == "__main__":
    def make_inputs(key, n, d_in, d_out):
        k_x, k_adj, k_ws, k_wn = jax.random.split(key, 4)
        x = jax.random.normal(k_x, (n, d_in), dtype=jnp.float32)
        a = (jax.random.uniform(k_adj, (n, n)) > 0.5).astype(jnp.float32)
        adj = jnp.clip(a + a.T + jnp.eye(n, dtype=jnp.float32), 0.0, 1.0)
        bound = 1.0 / (d_in ** 0.5)
        ws = jax.random.uniform(k_ws, (d_out, d_in), minval=-bound,
                                maxval=bound, dtype=jnp.float32)
        wn = jax.random.uniform(k_wn, (d_out, d_in), minval=-bound,
                                maxval=bound, dtype=jnp.float32)
        return x, adj, ws, wn

    key = jax.random.PRNGKey(0)
    k1, k2 = jax.random.split(key)

    # Small case matching the module's intent: N=8 nodes, 16 -> 32 features.
    x, adj, ws, wn = make_inputs(k1, 8, 16, 32)
    out = jax.block_until_ready(gnn_layer(x, adj, ws, wn))
    ref = gnn_layer_ref(x, adj, ws, wn)
    assert out.shape == (8, 32), out.shape
    assert jnp.allclose(out, ref, atol=1e-4, rtol=1e-4), "mismatch (small case)"

    # Larger case exercising a multi-tile grid on both the row and K axes.
    x2, adj2, ws2, wn2 = make_inputs(k2, 640, 16, 32)
    out2 = jax.block_until_ready(gnn_layer(x2, adj2, ws2, wn2))
    ref2 = gnn_layer_ref(x2, adj2, ws2, wn2)
    assert out2.shape == (640, 32), out2.shape
    assert jnp.allclose(out2, ref2, atol=1e-3, rtol=1e-3), "mismatch (tiled case)"

    print("KERNEL_OK")
</pallas_src>

<mosaic_0001>
module attributes {stable_mosaic.version = 11 : i64} {
  func.func @gnn_layer_kernel(%arg0: i32, %arg1: i32, %arg2: memref<128x128xf32, #tpu.memory_space<vmem>>, %arg3: memref<128x128xf32, #tpu.memory_space<vmem>>, %arg4: memref<128x128xbf16, #tpu.memory_space<vmem>>, %arg5: memref<256x128xf32, #tpu.memory_space<vmem>>, %arg6: memref<128x128xf32, #tpu.memory_space<vmem>>, %arg7: memref<128x256xf32, #tpu.memory_space<vmem>>) attributes {dimension_semantics = [#tpu.dimension_semantics<parallel>, #tpu.dimension_semantics<arbitrary>], iteration_bounds = array<i64: 1, 1>, scalar_prefetch = 0 : i64, scratch_operands = 1 : i64, tpu.core_type = #tpu.core_type<tc>, window_params = [{transform_indices = @transform_0, window_bounds = array<i64: 128, 128>}, {transform_indices = @transform_1, window_bounds = array<i64: 128, 128>}, {transform_indices = @transform_2, window_bounds = array<i64: 128, 128>}, {pipeline_mode = #tpu.pipeline_mode<synchronous>, transform_indices = @transform_3, window_bounds = array<i64: 256, 128>}, {transform_indices = @transform_4, window_bounds = array<i64: 128, 128>}]} {
    %c0 = arith.constant 0 : index
    %c0_0 = arith.constant 0 : index
    %0 = vector.load %arg4[%c0, %c0_0] : memref<128x128xbf16, #tpu.memory_space<vmem>>, vector<128x128xbf16>
    %1 = arith.extf %0 : vector<128x128xbf16> to vector<128x128xf32>
    %c0_1 = arith.constant 0 : index
    %c0_2 = arith.constant 0 : index
    %2 = vector.load %arg3[%c0_1, %c0_2] : memref<128x128xf32, #tpu.memory_space<vmem>>, vector<128x128xf32>
    %cst = arith.constant dense<0.000000e+00> : vector<128x128xf32>
    %3 = tpu.matmul %1, %2, %cst {dimension_numbers = #tpu.dot_dimension_numbers<[1], [0], [0], [1], [0, 0, 1, 1], [], []>} : vector<128x128xf32>, vector<128x128xf32>, vector<128x128xf32> -> vector<128x128xf32>
    %c0_i32 = arith.constant 0 : i32
    %4 = arith.cmpi eq, %arg1, %c0_i32 : i32
    %5 = arith.extui %4 : i1 to i32
    %c0_i32_3 = arith.constant 0 : i32
    %6 = arith.cmpi ne, %5, %c0_i32_3 : i32
    scf.if %6 {
      %c0_8 = arith.constant 0 : index
      %c0_9 = arith.constant 0 : index
      %13 = vector.load %arg2[%c0_8, %c0_9] : memref<128x128xf32, #tpu.memory_space<vmem>>, vector<128x128xf32>
      %c0_10 = arith.constant 0 : index
      %c0_11 = arith.constant 0 : index
      %14 = vector.load %arg7[%c0_10, %c0_11] : memref<128x256xf32, #tpu.memory_space<vmem>>, vector<128x128xf32>
      tpu.vector_store %arg7[%c0_10, %c0_11], %13 {strides = array<i32>} : memref<128x256xf32, #tpu.memory_space<vmem>>, vector<128x128xf32>,
      %c0_12 = arith.constant 0 : index
      %c128 = arith.constant 128 : index
      %15 = vector.load %arg7[%c0_12, %c128] : memref<128x256xf32, #tpu.memory_space<vmem>>, vector<128x128xf32>
      tpu.vector_store %arg7[%c0_12, %c128], %3 {strides = array<i32>} : memref<128x256xf32, #tpu.memory_space<vmem>>, vector<128x128xf32>,
    } else {
    }
    %c0_i32_4 = arith.constant 0 : i32
    %7 = arith.cmpi sgt, %arg1, %c0_i32_4 : i32
    %8 = arith.extui %7 : i1 to i32
    %c0_i32_5 = arith.constant 0 : i32
    %9 = arith.cmpi ne, %8, %c0_i32_5 : i32
    scf.if %9 {
      %c0_8 = arith.constant 0 : index
      %c128 = arith.constant 128 : index
      %13 = vector.load %arg7[%c0_8, %c128] : memref<128x256xf32, #tpu.memory_space<vmem>>, vector<128x128xf32>
      %14 = arith.addf %13, %3 : vector<128x128xf32>
      %c0_9 = arith.constant 0 : index
      %c128_10 = arith.constant 128 : index
      %15 = vector.load %arg7[%c0_9, %c128_10] : memref<128x256xf32, #tpu.memory_space<vmem>>, vector<128x128xf32>
      tpu.vector_store %arg7[%c0_9, %c128_10], %14 {strides = array<i32>} : memref<128x256xf32, #tpu.memory_space<vmem>>, vector<128x128xf32>,
    } else {
    }
    %c0_i32_6 = arith.constant 0 : i32
    %10 = arith.cmpi eq, %arg1, %c0_i32_6 : i32
    %11 = arith.extui %10 : i1 to i32
    %c0_i32_7 = arith.constant 0 : i32
    %12 = arith.cmpi ne, %11, %c0_i32_7 : i32
    scf.if %12 {
      %c0_8 = arith.constant 0 : index
      %c0_9 = arith.constant 0 : index
      %13 = vector.load %arg7[%c0_8, %c0_9] : memref<128x256xf32, #tpu.memory_space<vmem>>, vector<128x256xf32>
      %c0_10 = arith.constant 0 : index
      %c0_11 = arith.constant 0 : index
      %14 = vector.load %arg5[%c0_10, %c0_11] : memref<256x128xf32, #tpu.memory_space<vmem>>, vector<256x128xf32>
      %cst_12 = arith.constant dense<0.000000e+00> : vector<128x128xf32>
      %15 = tpu.matmul %13, %14, %cst_12 {dimension_numbers = #tpu.dot_dimension_numbers<[1], [0], [0], [1], [0, 0, 1, 1], [], []>} : vector<128x256xf32>, vector<256x128xf32>, vector<128x128xf32> -> vector<128x128xf32>
      %c0_13 = arith.constant 0 : index
      %c0_14 = arith.constant 0 : index
      %16 = vector.load %arg6[%c0_13, %c0_14] : memref<128x128xf32, #tpu.memory_space<vmem>>, vector<128x128xf32>
      tpu.vector_store %arg6[%c0_13, %c0_14], %15 {strides = array<i32>} : memref<128x128xf32, #tpu.memory_space<vmem>>, vector<128x128xf32>,
    } else {
    }
    return
  }
  func.func @transform_0(%arg0: i32, %arg1: i32) -> (i32, i32) {
    %c0_i32 = arith.constant 0 : i32
    %c0_i32_0 = arith.constant 0 : i32
    return %arg0, %c0_i32 : i32, i32
  }
  func.func @transform_1(%arg0: i32, %arg1: i32) -> (i32, i32) {
    %c0_i32 = arith.constant 0 : i32
    %c0_i32_0 = arith.constant 0 : i32
    return %arg1, %c0_i32 : i32, i32
  }
  func.func @transform_2(%arg0: i32, %arg1: i32) -> (i32, i32) {
    %c0_i32 = arith.constant 0 : i32
    return %arg0, %arg1 : i32, i32
  }
  func.func @transform_3(%arg0: i32, %arg1: i32) -> (i32, i32) {
    %c0_i32 = arith.constant 0 : i32
    %c0_i32_0 = arith.constant 0 : i32
    %c0_i32_1 = arith.constant 0 : i32
    return %c0_i32, %c0_i32_0 : i32, i32
  }
  func.func @transform_4(%arg0: i32, %arg1: i32) -> (i32, i32) {
    %c0_i32 = arith.constant 0 : i32
    %c0_i32_0 = arith.constant 0 : i32
    return %arg0, %c0_i32 : i32, i32
  }
}

</mosaic_0001>

<bundles_post_ra>
// kernel: tpu_custom_call.1
= control target key start
LH: loop header
LB: loop body
LE: loop exit
PB: predicated region body
PF: predicated region fallthrough
CT: control target
= control target key end

     0   :  { %9 = vsyncpa [#allocation4], 0  ;;  %s1184_s0 = inlined_call_operand.hbm [shape: f32[128,128], index: 0, kind: input, shape index: {}]   ;;  %s1185_s1 = inlined_call_operand.hbm [shape: f32[128,128], index: 1, kind: input, shape index: {}]   ;;  %s1186_s2 = inlined_call_operand.hbm [shape: bf16[128,128], index: 2, kind: input, shape index: {}]   ;;  %s1187_s3 = inlined_call_operand.hbm [shape: f32[256,128], index: 3, kind: input, shape index: {}]   ;;  %s1188_s4 = inlined_call_operand.hbm [shape: f32[128,128], index: 4, kind: output, shape index: {}]  }
   0x1   :  { %10 = vsyncpa [#allocation7], 0 }
   0x2   :  { %11 = vsyncpa [#allocation10], 0 }
   0x3   :  { %12 = vsyncpa [#allocation5], 0  ;;  %s1031_s15 = smov [#allocation6]   ;;  %s1032_s17 = smov [#allocation3]  }
   0x4   :  { %s30_s16 = sshll.u32 %s1031_s15, 4  ;;  %s18_s18 = sshll.u32 %s1032_s17, 4  ;;  %s31_s16 = int_to_ptr.vmem [resolvable:$true] %s30_s16  ;;  %s1065_s18 = int_to_ptr.vmem [resolvable:$true] %s18_s18 }
   0x5   :  { %s913_s21 = scalar_lea.hbm %s1185_s1, 2048 }
   0x6   :  { %p914_p0 = scmp.ne.s32.totalorder %s1185_s1, %s913_s21  ;;  %p917_p1 = scmp.lt.u32.totalorder %s913_s21, %s1185_s1 }
   0x8   :  { %p919_p2 = pnand %p917_p1, %p914_p0 }
   0xa   :  { %922 = shalt.err (!%p919_p2)
}
   0xb   :  { %s923_s26 = scalar_lea.vmem %s31_s16, 2048  ;;  %p928_p4 = scmp.lt.s32.totalorder %s31_s16, %s31_s16 }
   0xc   :  { %p924_p3 = scmp.ne.s32.totalorder %s31_s16, %s923_s26  ;;  %p929_p5 = scmp.lt.s32.totalorder %s923_s26, %s923_s26 }
   0xe   :  { %p930_p6 = por %p929_p5, %p928_p4 }
  0x10   :  { %p931_p7 = pnand %p930_p6, %p924_p3 }
  0x12   :  { %934 = shalt.err (!%p931_p7)
}
  0x13   :  { %s1033_s27 = smov 128   ;;  %s1034_s28 = smov 8  }
  0x14   :  { %36 = dma.hbm_to_vmem [thread:$0]  %s1185_s1, 2048, %s31_s16, [#allocation7], %s1033_s27, %s1033_s27, %s1034_s28  }
  0x15   :  { %s935_s7 = scalar_lea.hbm %s1184_s0, 2048 }
  0x16   :  { %p936_p8 = scmp.ne.s32.totalorder %s1184_s0, %s935_s7  ;;  %p939_p9 = scmp.lt.u32.totalorder %s935_s7, %s1184_s0 }
  0x18   :  { %p941_p10 = pnand %p939_p9, %p936_p8 }
  0x1a   :  { %944 = shalt.err (!%p941_p10)
}
  0x1b   :  { %s945_s12 = scalar_lea.vmem %s1065_s18, 2048  ;;  %p950_p12 = scmp.lt.s32.totalorder %s1065_s18, %s1065_s18 }
  0x1c   :  { %p946_p11 = scmp.ne.s32.totalorder %s1065_s18, %s945_s12  ;;  %p951_p13 = scmp.lt.s32.totalorder %s945_s12, %s945_s12 }
  0x1e   :  { %p952_p0 = por %p951_p13, %p950_p12 }
  0x20   :  { %p953_p1 = pnand %p952_p0, %p946_p11 }
  0x22   :  { %956 = shalt.err (!%p953_p1)
}
  0x23   :  { %24 = dma.hbm_to_vmem [thread:$0]  %s1184_s0, 2048, %s1065_s18, [#allocation4], %s1033_s27, %s1033_s27, %s1034_s28  }
  0x24   :  { %s1035_s14 = smov [#allocation8]   ;;  %s957_s19 = scalar_lea.hbm %s1186_s2, 1024 }
  0x25   :  { %s42_s15 = sshll.u32 %s1035_s14, 4  ;;  %p958_p2 = scmp.ne.s32.totalorder %s1186_s2, %s957_s19  ;;  %s43_s15 = int_to_ptr.vmem [resolvable:$true] %s42_s15 }
  0x26   :  { %p961_p3 = scmp.lt.u32.totalorder %s957_s19, %s1186_s2 }
  0x28   :  { %p963_p4 = pnand %p961_p3, %p958_p2 }
  0x2a   :  { %966 = shalt.err (!%p963_p4)
}
  0x2b   :  { %s967_s24 = scalar_lea.vmem %s43_s15, 1024  ;;  %p972_p6 = scmp.lt.s32.totalorder %s43_s15, %s43_s15 }
  0x2c   :  { %p968_p5 = scmp.ne.s32.totalorder %s43_s15, %s967_s24  ;;  %p973_p7 = scmp.lt.s32.totalorder %s967_s24, %s967_s24 }
  0x2e   :  { %p974_p8 = por %p973_p7, %p972_p6 }
  0x30   :  { %p975_p9 = pnand %p974_p8, %p968_p5 }
  0x32   :  { %978 = shalt.err (!%p975_p9)
}
  0x33   :  { %s1036_s0 = smov 64   ;;  %s1037_s18 = smov 4  }
  0x34   :  { %48 = dma.hbm_to_vmem [thread:$0]  %s1186_s2, 1024, %s43_s15, [#allocation7], %s1036_s0, %s1036_s0, %s1037_s18  }
  0x35   :  { %s1038_s29 = smov [#allocation9]   ;;  %s979_s7 = scalar_lea.hbm %s1187_s3, 4096 }
  0x36   :  { %s54_s30 = sshll.u32 %s1038_s29, 4  ;;  %p980_p10 = scmp.ne.s32.totalorder %s1187_s3, %s979_s7  ;;  %s55_s30 = int_to_ptr.vmem [resolvable:$true] %s54_s30 }
  0x37   :  { %p983_p11 = scmp.lt.u32.totalorder %s979_s7, %s1187_s3 }
  0x39   :  { %p985_p12 = pnand %p983_p11, %p980_p10 }
  0x3b   :  { %988 = shalt.err (!%p985_p12)
}
  0x3c   :  { %s989_s12 = scalar_lea.vmem %s55_s30, 4096  ;;  %p994_p0 = scmp.lt.s32.totalorder %s55_s30, %s55_s30 }
  0x3d   :  { %p990_p13 = scmp.ne.s32.totalorder %s55_s30, %s989_s12  ;;  %p995_p1 = scmp.lt.s32.totalorder %s989_s12, %s989_s12 }
  0x3f   :  { %p996_p2 = por %p995_p1, %p994_p0 }
  0x41   :  { %p997_p3 = pnand %p996_p2, %p990_p13 }
  0x43   :  { %1000 = shalt.err (!%p997_p3)
}
  0x44   :  { %60 = dma.hbm_to_vmem [thread:$0]  %s1187_s3, 4096, %s55_s30, [#allocation10], %s1033_s27, %s1033_s27, %s1034_s28  }
  0x45   :  { %1023 = dma.done.wait [#allocation4], 2048  }
  0x46   :  { %1024 = vsyncadd [#allocation4], 4294965248 }
  0x47   :  { %1025 = dma.done.wait [#allocation7], 3072  }
  0x48   :  { %1026 = vsyncadd [#allocation7], 4294964224 }
  0x49   :  { %1027 = dma.done.wait [#allocation10], 4096  }
  0x4a   :  { %1028 = vsyncadd [#allocation10], 4294963200  ;;  %v105_v0 = vld [vmem:[#allocation6] sm:$0xff]  ;;  %v106_v1 = vld [vmem:[#allocation6 + $0x8] sm:$0xff]  ;;  %s1039_s3 = smov [#allocation11]  }
  0x4b   :  { %v107_v2 = vld [vmem:[#allocation6 + $0x10] sm:$0xff]  ;;  %v824_v3 = vpack.c.bf16 %v106_v1, %v105_v0  ;;  %v108_v4 = vld [vmem:[#allocation6 + $0x18] sm:$0xff]  ;;  %v109_v6 = vld [vmem:[#allocation6 + $0x20] sm:$0xff]  ;;  %s603_s13 = sshll.u32 %s1039_s3, 4  ;;  %s604_s13 = int_to_ptr.vmem [resolvable:$true] %s603_s13 }
  0x4c   :  { %v828_v5 = vpack.c.bf16 %v108_v4, %v107_v2  ;;  %v110_v7 = vld [vmem:[#allocation6 + $0x28] sm:$0xff]  ;;  %v1129_v9 = vld [vmem:[#allocation8] sm:$0xff]   ;;  %v111_v10 = vld [vmem:[#allocation6 + $0x30] sm:$0xff]  ;;  %s1001_s14 = scalar_lea.vmem %s604_s13, 2048  ;;  %p1006_p5 = scmp.lt.s32.totalorder %s604_s13, %s604_s13 }
  0x4d   :  { %825 = vmatprep.subr.bf16.mxu0 %v824_v3  ;;  %v832_v8 = vpack.c.bf16 %v110_v7, %v109_v6  ;;  %v112_v11 = vld [vmem:[#allocation6 + $0x38] sm:$0xff]  ;;  %v619_v12 = vunpack.c.l.bf16 %v1129_v9  ;;  %v421_v13 = vld [vmem:[#allocation9 + $0x80] sm:$0xff]  ;;  %v422_v14 = vld [vmem:[#allocation9 + $0x88] sm:$0xff]  ;;  %v620_v0 = vunpack.c.h.bf16 %v1129_v9  ;;  %p1002_p4 = scmp.ne.s32.totalorder %s604_s13, %s1001_s14  ;;  %p1007_p6 = scmp.lt.s32.totalorder %s1001_s14, %s1001_s14 }
  0x4e   :  { %827 = vmatpush3.bf16.msra.mxu0 %v824_v3  ;;  %v405_v15 = vld [vmem:[#allocation9] sm:$0xff]  ;;  %v836_v16 = vpack.c.bf16 %v112_v11, %v111_v10  ;;  %v406_v17 = vld [vmem:[#allocation9 + $0x8] sm:$0xff]  ;;  %v423_v18 = vld [vmem:[#allocation9 + $0x90] sm:$0xff]  ;;  %v1132_v22 = vpack.c.bf16 %v422_v14, %v421_v13 }
  0x4f   :  { %829 = vmatprep.subr.bf16.mxu0 %v828_v5  ;;  %800 = vmatprep.mubr.f32.mxu0 %v619_v12  ;;  %v424_v19 = vld [vmem:[#allocation9 + $0x98] sm:$0xff]  ;;  %v113_v20 = vld [vmem:[#allocation6 + $0x40] sm:$0xff]  ;;  %v114_v21 = vld [vmem:[#allocation6 + $0x48] sm:$0xff]  ;;  %v1134_v23 = vpack.c.bf16 %v406_v17, %v405_v15  ;;  %p1008_p7 = por %p1007_p6, %p1006_p5 }
  0x50   :  { %v1136_v24 = vpack.c.bf16 %v424_v19, %v423_v18  ;;  %v407_v25 = vld [vmem:[#allocation9 + $0x10] sm:$0xff]  ;;  %v408_v26 = vld [vmem:[#allocation9 + $0x18] sm:$0xff]  ;;  %888 = vmatprep.subr.bf16.mxu1 %v1132_v22  ;;  %v840_v27 = vpack.c.bf16 %v114_v21, %v113_v20  ;;  %v425_v28 = vld [vmem:[#allocation9 + $0xa0] sm:$0xff] }
  0x51   :  { %v426_v29 = vld [vmem:[#allocation9 + $0xa8] sm:$0xff]  ;;  %896 = vmatpush3.bf16.msra.mxu1 %v1134_v23  ;;  %v115_v30 = vld [vmem:[#allocation6 + $0x50] sm:$0xff]  ;;  %v116_v31 = vld [vmem:[#allocation6 + $0x58] sm:$0xff]  ;;  %v1141_v32 = vpack.c.bf16 %v408_v26, %v407_v25  ;;  %p1009_p8 = pnand %p1008_p7, %p1002_p4 }
  0x52   :  { %831 = vmatpush3.bf16.msra.mxu0 %v828_v5  ;;  %889 = vmatprep.subr.bf16.mxu1 %v1136_v24  ;;  %v1143_v33 = vpack.c.bf16 %v426_v29, %v425_v28  ;;  %v409_v34 = vld [vmem:[#allocation9 + $0x20] sm:$0xff]  ;;  %v410_v35 = vld [vmem:[#allocation9 + $0x28] sm:$0xff]  ;;  %v844_v36 = vpack.c.bf16 %v116_v31, %v115_v30  ;;  %v427_v37 = vld [vmem:[#allocation9 + $0xb0] sm:$0xff] }
  0x53   :  { %833 = vmatprep.subr.bf16.mxu0 %v832_v8  ;;  %v428_v38 = vld [vmem:[#allocation9 + $0xb8] sm:$0xff]  ;;  %v117_v39 = vld [vmem:[#allocation6 + $0x60] sm:$0xff]  ;;  %v118_v40 = vld [vmem:[#allocation6 + $0x68] sm:$0xff]  ;;  %v1147_v41 = vpack.c.bf16 %v410_v35, %v409_v34 }
  0x54   :  { %v1149_v42 = vpack.c.bf16 %v428_v38, %v427_v37  ;;  %v411_v43 = vld [vmem:[#allocation9 + $0x30] sm:$0xff]  ;;  %v412_v44 = vld [vmem:[#allocation9 + $0x38] sm:$0xff]  ;;  %v848_v45 = vpack.c.bf16 %v118_v40, %v117_v39  ;;  %v429_v46 = vld [vmem:[#allocation9 + $0xc0] sm:$0xff] }
  0x55   :  { %897 = vmatpush3.bf16.msra.mxu1 %v1141_v32  ;;  %v430_v47 = vld [vmem:[#allocation9 + $0xc8] sm:$0xff]  ;;  %v119_v48 = vld [vmem:[#allocation6 + $0x70] sm:$0xff]  ;;  %v120_v49 = vld [vmem:[#allocation6 + $0x78] sm:$0xff]  ;;  %v1153_v50 = vpack.c.bf16 %v412_v44, %v411_v43 }
  0x56   :  { %835 = vmatpush3.bf16.msra.mxu0 %v832_v8  ;;  %890 = vmatprep.subr.bf16.mxu1 %v1143_v33  ;;  %v1155_v51 = vpack.c.bf16 %v430_v47, %v429_v46  ;;  %v413_v52 = vld [vmem:[#allocation9 + $0x40] sm:$0xff]  ;;  %v414_v53 = vld [vmem:[#allocation9 + $0x48] sm:$0xff]  ;;  %v852_v54 = vpack.c.bf16 %v120_v49, %v119_v48  ;;  %v431_v55 = vld [vmem:[#allocation9 + $0xd0] sm:$0xff] }
  0x57   :  { %837 = vmatprep.subr.bf16.mxu0 %v836_v16  ;;  %v432_v56 = vld [vmem:[#allocation9 + $0xd8] sm:$0xff]  ;;  %v874_v57 = vpack.c.bf16 %v414_v53, %v413_v52  ;;  %v415_v59 = vld [vmem:[#allocation9 + $0x50] sm:$0xff]  ;;  %v649_v61 = vld [vmem:[#allocation8 + $0x8] sm:$0xff]  }
  0x58   :  { %v876_v58 = vpack.c.bf16 %v432_v56, %v431_v55  ;;  %v416_v60 = vld [vmem:[#allocation9 + $0x58] sm:$0xff]  ;;  %v433_v62 = vld [vmem:[#allocation9 + $0xe0] sm:$0xff]  ;;  %v434_v63 = vld [vmem:[#allocation9 + $0xe8] sm:$0xff]  ;;  %v623_v2 = vunpack.c.l.bf16 %v649_v61  ;;  %v624_v10 = vunpack.c.h.bf16 %v649_v61 }
  0x59   :  { %898 = vmatpush3.bf16.msra.mxu1 %v1147_v41  ;;  %v878_v1 = vpack.c.bf16 %v416_v60, %v415_v59  ;;  %v880_v3 = vpack.c.bf16 %v434_v63, %v433_v62  ;;  %v417_v4 = vld [vmem:[#allocation9 + $0x60] sm:$0xff]  ;;  %v418_v5 = vld [vmem:[#allocation9 + $0x68] sm:$0xff]  ;;  %v650_v6 = vld [vmem:[#allocation8 + $0x10] sm:$0xff]  }
  0x5a   :  { %839 = vmatpush3.bf16.msra.mxu0 %v836_v16  ;;  %891 = vmatprep.subr.bf16.mxu1 %v1149_v42  ;;  %v435_v7 = vld [vmem:[#allocation9 + $0xf0] sm:$0xff]  ;;  %v436_v8 = vld [vmem:[#allocation9 + $0xf8] sm:$0xff]  ;;  %v882_v11 = vpack.c.bf16 %v418_v5, %v417_v4  ;;  %v627_v12 = vunpack.c.l.bf16 %v650_v6  ;;  %v628_v14 = vunpack.c.h.bf16 %v650_v6  ;;  %v652_v16 = vld [vmem:[#allocation8 + $0x20] sm:$0xff]  }
  0x5b   :  { %841 = vmatprep.subr.bf16.mxu0 %v840_v27  ;;  %v884_v9 = vpack.c.bf16 %v436_v8, %v435_v7  ;;  %v651_v13 = vld [vmem:[#allocation8 + $0x18] sm:$0xff]   ;;  %v635_v18 = vunpack.c.l.bf16 %v652_v16  ;;  %v653_v19 = vld [vmem:[#allocation8 + $0x28] sm:$0xff]   ;;  %v636_v20 = vunpack.c.h.bf16 %v652_v16  ;;  %v419_v29 = vld [vmem:[#allocation9 + $0x70] sm:$0xff] }
  0x5c   :  { %v631_v15 = vunpack.c.l.bf16 %v651_v13  ;;  %v632_v17 = vunpack.c.h.bf16 %v651_v13  ;;  %v639_v21 = vunpack.c.l.bf16 %v653_v19  ;;  %v655_v25 = vld [vmem:[#allocation8 + $0x38] sm:$0xff]   ;;  %v272_v39 = vld [vmem:[#allocation3 + $0x10] sm:$0xff]  ;;  %v274_v40 = vld [vmem:[#allocation3 + $0x20] sm:$0xff] }
  0x5d   :  { %899 = vmatpush3.bf16.msra.mxu1 %v1153_v50  ;;  %v648_v28 = vunpack.c.h.bf16 %v655_v25  ;;  %v420_v30 = vld [vmem:[#allocation9 + $0x78] sm:$0xff]  ;;  %v275_v43 = vld [vmem:[#allocation3 + $0x28] sm:$0xff]  ;;  %v276_v46 = vld [vmem:[#allocation3 + $0x30] sm:$0xff] }
  0x5e   :  { %843 = vmatpush3.bf16.msra.mxu0 %v840_v27  ;;  %892 = vmatprep.subr.bf16.mxu1 %v1155_v51  ;;  %v647_v27 = vunpack.c.l.bf16 %v655_v25  ;;  %v886_v31 = vpack.c.bf16 %v420_v30, %v419_v29  ;;  %v273_v44 = vld [vmem:[#allocation3 + $0x18] sm:$0xff]  ;;  %v278_v52 = vld [vmem:[#allocation3 + $0x40] sm:$0xff]  ;;  %v279_v55 = vld [vmem:[#allocation3 + $0x48] sm:$0xff] }
  0x5f   :  { %845 = vmatprep.subr.bf16.mxu0 %v844_v36  ;;  %v277_v49 = vld [vmem:[#allocation3 + $0x38] sm:$0xff]  ;;  %v282_v60 = vld [vmem:[#allocation3 + $0x60] sm:$0xff]  ;;  %v283_v61 = vld [vmem:[#allocation3 + $0x68] sm:$0xff] }
  0x60   :  { %v281_v59 = vld [vmem:[#allocation3 + $0x58] sm:$0xff]  ;;  %v284_v62 = vld [vmem:[#allocation3 + $0x70] sm:$0xff] }
  0x61   :  { %900 = vmatpush3.bf16.msra.mxu1 %v874_v57  ;;  %v285_v63 = vld [vmem:[#allocation3 + $0x78] sm:$0xff] }
  0x62   :  { %847 = vmatpush3.bf16.msra.mxu0 %v844_v36  ;;  %893 = vmatprep.subr.bf16.mxu1 %v876_v58  ;;  %v271_v36 = vld [vmem:[#allocation3 + $0x8] sm:$0xff] }
  0x63   :  { %849 = vmatprep.subr.bf16.mxu0 %v848_v45 }
  0x65   :  { %901 = vmatpush3.bf16.msra.mxu1 %v878_v1 }
  0x66   :  { %851 = vmatpush3.bf16.msra.mxu0 %v848_v45  ;;  %894 = vmatprep.subr.bf16.mxu1 %v880_v3 }
  0x67   :  { %853 = vmatprep.subr.bf16.mxu0 %v852_v54 }
  0x69   :  { %902 = vmatpush3.bf16.msra.mxu1 %v882_v11 }
  0x6a   :  { %855 = vmatpush3.bf16.msra.mxu0 %v852_v54  ;;  %895 = vmatprep.subr.bf16.mxu1 %v884_v9 }
  0x6b   :  { %857 = vmatprep.subr.bf16.mxu0 %v1132_v22  ;;  %v654_v22 = vld [vmem:[#allocation8 + $0x30] sm:$0xff]  }
  0x6c   :  { %v644_v26 = vunpack.c.h.bf16 %v654_v22 }
  0x6d   :  { %801 = vmatmul.mubr.f32.vlgmr.msra.gmra.mrb[0].mxu0 %v620_v0  ;;  %903 = vmatpush3.bf16.msra.mxu1 %v886_v31 }
  0x6e   :  { %803 = vmatprep.mubr.f32.mxu0 %v623_v2  ;;  %859 = vmatpush3.bf16.msra.mxu0 %v1134_v23  ;;  %v640_v23 = vunpack.c.h.bf16 %v653_v19 }
  0x6f   :  { %861 = vmatprep.subr.bf16.mxu0 %v1136_v24  ;;  %v643_v24 = vunpack.c.l.bf16 %v654_v22 }
  0x71   :  { %804 = vmatmul.mubr.f32.gmra.mrb[2].mxu0 %v624_v10 }
  0x72   :  { %806 = vmatprep.mubr.f32.mxu0 %v627_v12  ;;  %863 = vmatpush3.bf16.msra.mxu0 %v1141_v32 }
  0x73   :  { %865 = vmatprep.subr.bf16.mxu0 %v1143_v33  ;;  %v270_v33 = vld [vmem:[#allocation3] sm:$0xff] }
  0x75   :  { %807 = vmatmul.mubr.f32.gmra.mrb[4].mxu0 %v628_v14 }
  0x76   :  { %809 = vmatprep.mubr.f32.mxu0 %v631_v15  ;;  %867 = vmatpush3.bf16.msra.mxu0 %v1147_v41 }
  0x77   :  { %869 = vmatprep.subr.bf16.mxu0 %v1149_v42 }
  0x79   :  { %810 = vmatmul.mubr.f32.gmra.mrb[6].mxu0 %v632_v17 }
  0x7a   :  { %812 = vmatprep.mubr.f32.mxu0 %v635_v18  ;;  %871 = vmatpush3.bf16.msra.mxu0 %v1153_v50 }
  0x7b   :  { %873 = vmatprep.subr.bf16.mxu0 %v1155_v51 }
  0x7d   :  { %813 = vmatmul.mubr.f32.gmra.mrb[8].mxu0 %v636_v20 }
  0x7e   :  { %815 = vmatprep.mubr.f32.mxu0 %v639_v21  ;;  %875 = vmatpush3.bf16.msra.mxu0 %v874_v57 }
  0x7f   :  { %877 = vmatprep.subr.bf16.mxu0 %v876_v58  ;;  %v280_v58 = vld [vmem:[#allocation3 + $0x50] sm:$0xff] }
  0x81   :  { %816 = vmatmul.mubr.f32.gmra.mrb[10].mxu0 %v640_v23 }
  0x82   :  { %818 = vmatprep.mubr.f32.mxu0 %v643_v24  ;;  %879 = vmatpush3.bf16.msra.mxu0 %v878_v1 }
  0x83   :  { %881 = vmatprep.subr.bf16.mxu0 %v880_v3 }
  0x85   :  { %819 = vmatmul.mubr.f32.gmra.mrb[12].mxu0 %v644_v26 }
  0x86   :  { %821 = vmatprep.mubr.f32.mxu0 %v647_v27  ;;  %883 = vmatpush3.bf16.msra.mxu0 %v882_v11 }
  0x87   :  { %885 = vmatprep.subr.bf16.mxu0 %v884_v9 }
  0x89   :  { %822 = vmatmul.mubr.f32.gmra.mrb[14].mxu0 %v648_v28 }
  0x8a   :  { %887 = vmatpush3.bf16.msra.mxu0 %v886_v31 }
 0x140   :  { %v802_v32 = vpop.f32.mrb[0].mxu0 }
 0x141   :  { %v187_v34 = vpop.f32.mrb[1].mxu0 }
 0x142   :  { %501 = vmatprep.mubr.f32.mxu0 %v187_v34 }
 0x143   :  { %502 = vmatmul.mubr.f32.vlgmr.msra.gmra.mrb[16].mxu0 %v270_v33 }
 0x144   :  { %v805_v35 = vpop.f32.mrb[2].mxu0  ;;  %506 = vmatprep.mubr.f32.mxu0 %v802_v32 }
 0x145   :  { %v197_v37 = vpop.f32.mrb[3].mxu0 }
 0x147   :  { %507 = vmatmul.mubr.f32.gmra.mrb[18].mxu0 %v271_v36 }
 0x148   :  { %v808_v38 = vpop.f32.mrb[4].mxu0  ;;  %511 = vmatprep.mubr.f32.mxu0 %v197_v37 }
 0x149   :  { %v207_v41 = vpop.f32.mrb[5].mxu0 }
 0x14a   :  { %521 = vmatprep.mubr.f32.mxu1 %v207_v41 }
 0x14b   :  { %512 = vmatmul.mubr.f32.gmra.mrb[20].mxu0 %v272_v39  ;;  %522 = vmatmul.mubr.f32.vlgmr.msra.gmra.mrb[0].mxu1 %v274_v40 }
 0x14c   :  { %516 = vmatprep.mubr.f32.mxu0 %v805_v35  ;;  %526 = vmatprep.mubr.f32.mxu1 %v808_v38  ;;  %v811_v42 = vpop.f32.mrb[6].mxu0 }
 0x14d   :  { %v217_v45 = vpop.f32.mrb[7].mxu0 }
 0x14f   :  { %527 = vmatmul.mubr.f32.gmra.mrb[2].mxu1 %v275_v43  ;;  %517 = vmatmul.mubr.f32.gmra.mrb[22].mxu0 %v273_v44 }
 0x150   :  { %531 = vmatprep.mubr.f32.mxu1 %v217_v45  ;;  %v814_v47 = vpop.f32.mrb[8].mxu0 }
 0x151   :  { %v227_v48 = vpop.f32.mrb[9].mxu0 }
 0x153   :  { %532 = vmatmul.mubr.f32.gmra.mrb[4].mxu1 %v276_v46 }
 0x154   :  { %536 = vmatprep.mubr.f32.mxu1 %v811_v42  ;;  %v817_v50 = vpop.f32.mrb[10].mxu0 }
 0x155   :  { %v237_v51 = vpop.f32.mrb[11].mxu0 }
 0x157   :  { %537 = vmatmul.mubr.f32.gmra.mrb[6].mxu1 %v277_v49 }
 0x158   :  { %541 = vmatprep.mubr.f32.mxu1 %v227_v48  ;;  %v820_v53 = vpop.f32.mrb[12].mxu0 }
 0x159   :  { %v247_v54 = vpop.f32.mrb[13].mxu0 }
 0x15b   :  { %542 = vmatmul.mubr.f32.gmra.mrb[8].mxu1 %v278_v52 }
 0x15c   :  { %546 = vmatprep.mubr.f32.mxu1 %v814_v47  ;;  %v823_v56 = vpop.f32.mrb[14].mxu0 }
 0x15d   :  { %v257_v57 = vpop.f32.mrb[15].mxu0 }
 0x15f   :  { %547 = vmatmul.mubr.f32.gmra.mrb[10].mxu1 %v279_v55 }
 0x160   :  { %551 = vmatprep.mubr.f32.mxu1 %v237_v51 }
 0x163   :  { %552 = vmatmul.mubr.f32.gmra.mrb[12].mxu1 %v280_v58 }
 0x164   :  { %556 = vmatprep.mubr.f32.mxu1 %v817_v50 }
 0x167   :  { %557 = vmatmul.mubr.f32.gmra.mrb[14].mxu1 %v281_v59 }
 0x168   :  { %561 = vmatprep.mubr.f32.mxu1 %v247_v54 }
 0x16b   :  { %562 = vmatmul.mubr.f32.gmra.mrb[16].mxu1 %v282_v60 }
 0x16c   :  { %566 = vmatprep.mubr.f32.mxu1 %v820_v53 }
 0x16f   :  { %567 = vmatmul.mubr.f32.gmra.mrb[18].mxu1 %v283_v61 }
 0x170   :  { %571 = vmatprep.mubr.f32.mxu1 %v257_v57 }
 0x173   :  { %572 = vmatmul.mubr.f32.gmra.mrb[20].mxu1 %v284_v62 }
 0x174   :  { %576 = vmatprep.mubr.f32.mxu1 %v823_v56 }
 0x177   :  { %577 = vmatmul.mubr.f32.gmra.mrb[22].mxu1 %v285_v63 }
 0x216   :  { %v720_v0 = vpop.f32.mrb[16].mxu0 }
 0x217   :  { %v721_v1 = vpop.f32.mrb[17].mxu0 }
 0x218   :  { %v722_v2 = vadd.f32 %v721_v1, %v720_v0 }
 0x21a   :  { %582 = vst [vmem:[#allocation11] sm:$0xff] %v722_v2  ;;  %v723_v3 = vpop.f32.mrb[18].mxu0 }
 0x21b   :  { %v724_v4 = vpop.f32.mrb[19].mxu0 }
 0x21c   :  { %v725_v5 = vadd.f32 %v724_v4, %v723_v3 }
 0x21e   :  { %v732_v6 = vpop.f32.mrb[0].mxu1  ;;  %583 = vst [vmem:[#allocation11 + $0x8] sm:$0xff] %v725_v5  ;;  %v726_v7 = vpop.f32.mrb[20].mxu0 }
 0x21f   :  { %v733_v8 = vpop.f32.mrb[1].mxu1  ;;  %v727_v10 = vpop.f32.mrb[21].mxu0 }
 0x220   :  { %v734_v11 = vadd.f32 %v733_v8, %v732_v6  ;;  %v728_v12 = vadd.f32 %v727_v10, %v726_v7 }
 0x222   :  { %586 = vst [vmem:[#allocation11 + $0x20] sm:$0xff] %v734_v11  ;;  %v735_v9 = vpop.f32.mrb[2].mxu1  ;;  %584 = vst [vmem:[#allocation11 + $0x10] sm:$0xff] %v728_v12  ;;  %v729_v13 = vpop.f32.mrb[22].mxu0 }
 0x223   :  { %v736_v14 = vpop.f32.mrb[3].mxu1  ;;  %v730_v15 = vpop.f32.mrb[23].mxu0 }
 0x224   :  { %v737_v16 = vadd.f32 %v736_v14, %v735_v9  ;;  %v731_v17 = vadd.f32 %v730_v15, %v729_v13 }
 0x226   :  { %587 = vst [vmem:[#allocation11 + $0x28] sm:$0xff] %v737_v16  ;;  %v738_v18 = vpop.f32.mrb[4].mxu1  ;;  %585 = vst [vmem:[#allocation11 + $0x18] sm:$0xff] %v731_v17 }
 0x227   :  { %v739_v19 = vpop.f32.mrb[5].mxu1 }
 0x228   :  { %v740_v20 = vadd.f32 %v739_v19, %v738_v18 }
 0x22a   :  { %588 = vst [vmem:[#allocation11 + $0x30] sm:$0xff] %v740_v20  ;;  %v741_v21 = vpop.f32.mrb[6].mxu1 }
 0x22b   :  { %v742_v22 = vpop.f32.mrb[7].mxu1 }
 0x22c   :  { %v743_v23 = vadd.f32 %v742_v22, %v741_v21 }
 0x22e   :  { %589 = vst [vmem:[#allocation11 + $0x38] sm:$0xff] %v743_v23  ;;  %v744_v24 = vpop.f32.mrb[8].mxu1 }
 0x22f   :  { %v745_v25 = vpop.f32.mrb[9].mxu1 }
 0x230   :  { %v746_v26 = vadd.f32 %v745_v25, %v744_v24 }
 0x232   :  { %590 = vst [vmem:[#allocation11 + $0x40] sm:$0xff] %v746_v26  ;;  %v747_v27 = vpop.f32.mrb[10].mxu1 }
 0x233   :  { %v748_v28 = vpop.f32.mrb[11].mxu1 }
 0x234   :  { %v749_v29 = vadd.f32 %v748_v28, %v747_v27 }
 0x236   :  { %591 = vst [vmem:[#allocation11 + $0x48] sm:$0xff] %v749_v29  ;;  %v750_v30 = vpop.f32.mrb[12].mxu1 }
 0x237   :  { %v751_v31 = vpop.f32.mrb[13].mxu1 }
 0x238   :  { %v752_v32 = vadd.f32 %v751_v31, %v750_v30 }
 0x23a   :  { %592 = vst [vmem:[#allocation11 + $0x50] sm:$0xff] %v752_v32  ;;  %v753_v33 = vpop.f32.mrb[14].mxu1 }
 0x23b   :  { %v754_v34 = vpop.f32.mrb[15].mxu1 }
 0x23c   :  { %v755_v35 = vadd.f32 %v754_v34, %v753_v33 }
 0x23e   :  { %593 = vst [vmem:[#allocation11 + $0x58] sm:$0xff] %v755_v35  ;;  %v756_v36 = vpop.f32.mrb[16].mxu1 }
 0x23f   :  { %v757_v37 = vpop.f32.mrb[17].mxu1 }
 0x240   :  { %v758_v38 = vadd.f32 %v757_v37, %v756_v36 }
 0x242   :  { %594 = vst [vmem:[#allocation11 + $0x60] sm:$0xff] %v758_v38  ;;  %v759_v39 = vpop.f32.mrb[18].mxu1 }
 0x243   :  { %v760_v40 = vpop.f32.mrb[19].mxu1 }
 0x244   :  { %v761_v41 = vadd.f32 %v760_v40, %v759_v39 }
 0x246   :  { %595 = vst [vmem:[#allocation11 + $0x68] sm:$0xff] %v761_v41  ;;  %v762_v42 = vpop.f32.mrb[20].mxu1 }
 0x247   :  { %v763_v43 = vpop.f32.mrb[21].mxu1 }
 0x248   :  { %v764_v44 = vadd.f32 %v763_v43, %v762_v42 }
 0x24a   :  { %596 = vst [vmem:[#allocation11 + $0x70] sm:$0xff] %v764_v44  ;;  %v765_v45 = vpop.f32.mrb[22].mxu1 }
 0x24b   :  { %v766_v46 = vpop.f32.mrb[23].mxu1 }
 0x24c   :  { %v767_v47 = vadd.f32 %v766_v46, %v765_v45 }
 0x24e   :  { %597 = vst [vmem:[#allocation11 + $0x78] sm:$0xff] %v767_v47 }
 0x24f   :  { %1012 = shalt.err (!%p1009_p8)
}
 0x250   :  { %s1013_s17 = scalar_lea.hbm %s1188_s4, 2048 }
 0x251   :  { %p1014_p9 = scmp.ne.s32.totalorder %s1188_s4, %s1013_s17  ;;  %p1017_p10 = scmp.lt.u32.totalorder %s1013_s17, %s1188_s4 }
 0x253   :  { %p1019_p11 = pnand %p1017_p10, %p1014_p9 }
 0x255   :  { %1022 = shalt.err (!%p1019_p11)
}
 0x256   :  { %609 = dma.vmem_to_hbm [thread:$0]  %s604_s13, 2048, %s1188_s4, [#allocation5], %s1033_s27, %s1033_s27, %s1034_s28  }
 0x257   :  { %1029 = dma.done.wait [#allocation5], 2048  }
 0x258   :  { %1030 = vsyncadd [#allocation5], 4294965248 }
 0x259   :  { %613 = vsyncpa [#allocation4], 1 }
 0x25a   :  { %614 = vsyncpa [#allocation7], 1 }
 0x25b   :  { %615 = vsyncpa [#allocation10], 1 }
 0x25c   :  { %616 = vsyncpa [#allocation5], 1 }

</bundles_post_ra>
